<compile_context>
chip_gen: v7x
topology: tpu7x:2x2x1
jax: 0.10.0
libtpu: 0.0.40
codegen_flags: <defaults>
</compile_context>

<pallas_src>
import functools
import math

import jax
import jax.numpy as jnp
from jax.experimental import pallas as pl
from jax.experimental.pallas import tpu as pltpu

_INV_SQRT2 = 1.0 / math.sqrt(2.0)
_GELU_C = 0.7978845608028654          # sqrt(2/pi)


def _block_kernel(x_ref, g_ref, bt_ref, w1_ref, b1_ref, w2_ref, b2_ref,
                  o_ref, xn_ref, acc_ref, *, eps, approximate_gelu):
    k = pl.program_id(1)

    @pl.when(k == 0)
    def _layernorm():
        # LayerNorm over emb (f32), computed once per row tile, stored to scratch.
        xv = x_ref[...].astype(jnp.float32)
        mu = jnp.mean(xv, axis=-1, keepdims=True)
        xc = xv - mu
        var = jnp.mean(xc * xc, axis=-1, keepdims=True)
        inv = jax.lax.rsqrt(var + eps)
        xn = xc * inv * g_ref[...].astype(jnp.float32) + bt_ref[...].astype(jnp.float32)
        xn_ref[...] = xn.astype(xn_ref.dtype)

    # fc1 on this ffn tile: (tm, emb) @ (emb, tk) -> (tm, tk), f32 MXU accumulation.
    h = jnp.dot(xn_ref[...], w1_ref[...], preferred_element_type=jnp.float32)
    h = h + b1_ref[...].astype(jnp.float32)
    if approximate_gelu:
        # tanh GELU: routes the transcendental to the EUP slot (idle under MXU work).
        h = 0.5 * h * (1.0 + jnp.tanh(_GELU_C * (h + 0.044715 * h * h * h)))
    else:
        # exact erf GELU (torch.nn.GELU default) -- long f32 VPU polynomial, slower.
        h = 0.5 * h * (1.0 + jax.lax.erf(h * _INV_SQRT2))
    # TODO(synk): both dropouts (FFN activation dropout and the block's dropout) are
    # identity in eval/inference; training mode would use pltpu.prng_seed /
    # pltpu.stateful_bernoulli here.

    # fc2 partial product on this ffn tile, accumulated in a f32 VMEM scratch.
    p = jnp.dot(h.astype(w2_ref.dtype), w2_ref[...], preferred_element_type=jnp.float32)

    @pl.when(k == 0)
    def _acc_init():
        acc_ref[...] = p                      # write-through: no zero-fill + re-read

    @pl.when(k > 0)
    def _acc_add():
        acc_ref[...] += p

    @pl.when(k == pl.num_programs(1) - 1)
    def _finalize():
        y = acc_ref[...] + b2_ref[...].astype(jnp.float32)
        y = y + x_ref[...].astype(jnp.float32)            # residual add
        o_ref[...] = y.astype(o_ref.dtype)


def _pick_k_tile(ffn_dim, want):
    """Largest ffn tile <= want dividing ffn_dim; prefer 256-multiples (v6e/v7x MXU)."""
    want = max(1, min(want, ffn_dim))
    if ffn_dim % want == 0:
        return want
    for step in (256, 128):
        t = (want // step) * step
        while t >= step:
            if ffn_dim % t == 0:
                return t
            t -= step
    return ffn_dim


def _vmem_capacity_bytes():
    try:
        return int(pltpu.get_tpu_info().vmem_capacity_bytes)
    except Exception:
        return 64 << 20            # conservative (v7x per-TensorCore VMEM)


def normalized_residual_ffn_block(x, gamma, beta, w1, b1, w2, b2, *,
                                  tm=None, tk_ffn=None, eps=1e-5,
                                  compute_dtype=jnp.bfloat16,
                                  approximate_gelu=True,
                                  vmem_limit_bytes=None):
    """out = x + FFN(LayerNorm(x)).  x: (..., emb).  gamma/beta: (emb,).
    w1: (emb, ffn), b1: (ffn,), w2: (ffn, emb), b2: (emb,)  (transposed vs nn.Linear).

    Defaults: bf16 MXU compute (f32 accumulation), tanh GELU, W1/W2 held VMEM-resident
    when they fit the per-generation VMEM budget, otherwise streamed along the ffn
    axis with 3-deep buffering.  emb/ffn should ideally be multiples of 256 (v6e/v7x
    MXU width); 128 is optimal on v5e."""
    emb_dim = x.shape[-1]
    ffn_dim = w1.shape[1]
    lead = x.shape[:-1]
    m = int(math.prod(lead)) if lead else 1
    x2d = x.reshape(m, emb_dim)

    if compute_dtype is not None:
        w1 = w1.astype(compute_dtype)
        w2 = w2.astype(compute_dtype)
    cmp_dt = w1.dtype

    # ---- generation-aware budgets -------------------------------------------------
    phys_vmem = _vmem_capacity_bytes()
    big_vmem = phys_vmem >= (96 << 20)                    # v5e / v6e: 128 MiB physical
    vmem_cap = (100 << 20) if big_vmem else (48 << 20)    # headroom (esp. v7x: 64 MiB)
    if tm is None:
        tm = 512 if big_vmem else 256

    # Row tile: clamp to problem size; keep >= 2 row tiles so v7x's 2 TCs both get work.
    m8 = pl.cdiv(m, 8) * 8
    tm_eff = max(8, min(tm, m8))
    while pl.cdiv(m, tm_eff) < 2 and tm_eff > 8:
        tm_eff = max(8, (tm_eff // 2) // 8 * 8)

    isz = lambda dt: jnp.dtype(dt).itemsize

    def est_vmem(tm_e, tk_e, w_bufs):
        b = 2 * tm_e * emb_dim * isz(x2d.dtype)           # x tile (double-buffered)
        b += 2 * 2 * emb_dim * isz(gamma.dtype)           # gamma + beta
        b += w_bufs * emb_dim * tk_e * isz(cmp_dt)        # W1 tile(s)
        b += 2 * tk_e * isz(b1.dtype)                     # b1 tile
        b += w_bufs * tk_e * emb_dim * isz(cmp_dt)        # W2 tile(s)
        b += 2 * emb_dim * isz(b2.dtype)                  # b2
        b += 2 * tm_e * emb_dim * isz(x.dtype)            # out tile
        b += tm_e * emb_dim * isz(cmp_dt)                 # xn scratch
        b += tm_e * emb_dim * 4                           # f32 accumulator
        return b

    # ---- ffn tiling: hold W1/W2 resident when they fit, else stream ---------------
    if tk_ffn is not None:
        tk = _pick_k_tile(ffn_dim, tk_ffn)
    else:
        tk = ffn_dim                                      # resident weights: DMA'd once
        if est_vmem(tm_eff, tk, 2) > vmem_cap:
            tk = _pick_k_tile(ffn_dim, 512)               # fall back to k-streaming
    num_k = ffn_dim // tk
    w_bufs = 2 if num_k == 1 else 3                       # Buffered(3) while streaming

    # If the estimate exceeds the budget, shrink the row tile, then the ffn tile.
    while est_vmem(tm_eff, tk, w_bufs) > vmem_cap and tm_eff > 8:
        tm_eff = max(8, (tm_eff // 2) // 8 * 8)
    while est_vmem(tm_eff, tk, w_bufs) > vmem_cap:
        new_tk = _pick_k_tile(ffn_dim, tk // 2)
        if new_tk >= tk:
            break
        tk = new_tk
        num_k = ffn_dim // tk
        w_bufs = 3

    est = est_vmem(tm_eff, tk, w_bufs)
    if vmem_limit_bytes is None:
        # Always set it: v5e's default scoped limit is only 16 MiB.
        vmem_limit_bytes = int(min(max(est * 1.25, float(16 << 20)), float(vmem_cap)))

    grid = (pl.cdiv(m, tm_eff), num_k)

    g2d = gamma.reshape(1, emb_dim)
    bt2d = beta.reshape(1, emb_dim)
    b1_2d = b1.reshape(1, ffn_dim)
    b2_2d = b2.reshape(1, emb_dim)

    def _w_spec(shape, index_map):
        if w_bufs <= 2:
            return pl.BlockSpec(shape, index_map)
        try:
            return pl.BlockSpec(shape, index_map, pipeline_mode=pl.Buffered(w_bufs))
        except TypeError:                                  # older jax: no pipeline_mode
            return pl.BlockSpec(shape, index_map)

    out2d = pl.pallas_call(
        functools.partial(_block_kernel, eps=eps, approximate_gelu=approximate_gelu),
        out_shape=jax.ShapeDtypeStruct((m, emb_dim), x.dtype),
        grid_spec=pltpu.PrefetchScalarGridSpec(
            num_scalar_prefetch=0,
            grid=grid,
            in_specs=[
                pl.BlockSpec((tm_eff, emb_dim), lambda i, k: (i, 0)),   # x tile
                pl.BlockSpec((1, emb_dim), lambda i, k: (0, 0)),        # gamma
                pl.BlockSpec((1, emb_dim), lambda i, k: (0, 0)),        # beta
                _w_spec((emb_dim, tk), lambda i, k: (0, k)),            # W1 ffn-tile
                pl.BlockSpec((1, tk), lambda i, k: (0, k)),             # b1 ffn-tile
                _w_spec((tk, emb_dim), lambda i, k: (k, 0)),            # W2 ffn-tile
                pl.BlockSpec((1, emb_dim), lambda i, k: (0, 0)),        # b2
            ],
            out_specs=pl.BlockSpec((tm_eff, emb_dim), lambda i, k: (i, 0)),
            scratch_shapes=[
                pltpu.VMEM((tm_eff, emb_dim), cmp_dt),        # normalized x
                pltpu.VMEM((tm_eff, emb_dim), jnp.float32),   # fc2 accumulator
            ],
        ),
        compiler_params=pltpu.CompilerParams(
            dimension_semantics=("parallel", "arbitrary"),
            vmem_limit_bytes=vmem_limit_bytes),
    )(x2d, g2d, bt2d, w1, b1_2d, w2, b2_2d)

    return out2d.reshape(*lead, emb_dim)


def init_params(key, emb_dim, ffn_dim, dtype=jnp.float32):
    """Deterministic init mirroring nn.Linear uniform(-1/sqrt(fan_in), ...) + LayerNorm."""
    k1, k2, k3, k4, k5, k6 = jax.random.split(key, 6)
    bound1 = 1.0 / math.sqrt(emb_dim)
    bound2 = 1.0 / math.sqrt(ffn_dim)
    w1 = jax.random.uniform(k1, (emb_dim, ffn_dim), dtype, -bound1, bound1)
    b1 = jax.random.uniform(k2, (ffn_dim,), dtype, -bound1, bound1)
    w2 = jax.random.uniform(k3, (ffn_dim, emb_dim), dtype, -bound2, bound2)
    b2 = jax.random.uniform(k4, (emb_dim,), dtype, -bound2, bound2)
    # PyTorch LayerNorm init is ones/zeros; perturb slightly to exercise the affine path.
    gamma = (1.0 + 0.1 * jax.random.normal(k5, (emb_dim,))).astype(dtype)
    beta = (0.1 * jax.random.normal(k6, (emb_dim,))).astype(dtype)
    return gamma, beta, w1, b1, w2, b2


def _reference(x, gamma, beta, w1, b1, w2, b2, *, eps=1e-5, approximate=True):
    """Pure-JAX reference (dropout is identity in eval mode)."""
    mu = x.mean(-1, keepdims=True)
    var = ((x - mu) ** 2).mean(-1, keepdims=True)
    xn = (x - mu) * jax.lax.rsqrt(var + eps) * gamma + beta
    h = jax.nn.gelu(xn @ w1 + b1, approximate=approximate)
    return x + (h @ w2 + b2)


if __name__ == "__main__":
    key = jax.random.PRNGKey(0)
    kx, kp, kx2 = jax.random.split(key, 3)

    emb_dim, ffn_dim = 128, 512
    gamma, beta, w1, b1, w2, b2 = init_params(kp, emb_dim, ffn_dim)

    # --- test 1: default fast path (bf16 MXU compute, tanh GELU, resident weights) ---
    x = jax.random.normal(kx, (2, 8, emb_dim), jnp.float32)
    out = normalized_residual_ffn_block(x, gamma, beta, w1, b1, w2, b2)
    out = jax.block_until_ready(out)
    ref = _reference(x, gamma, beta, w1, b1, w2, b2, approximate=True)
    assert out.shape == x.shape and out.dtype == x.dtype
    assert jnp.allclose(out, ref, atol=5e-2, rtol=5e-2), \
        float(jnp.max(jnp.abs(out - ref)))            # bf16-aware tolerance

    # --- test 2: f32 exact-GELU path, ragged row count, streamed ffn tiles -----------
    x2 = jax.random.normal(kx2, (3, 5, emb_dim), jnp.float32)   # m = 15 (not /8, not /tm)
    out2 = normalized_residual_ffn_block(
        x2, gamma, beta, w1, b1, w2, b2,
        compute_dtype=jnp.float32, approximate_gelu=False, tk_ffn=256)
    out2 = jax.block_until_ready(out2)
    ref2 = _reference(x2, gamma, beta, w1, b1, w2, b2, approximate=False)
    assert out2.shape == x2.shape
    assert jnp.allclose(out2, ref2, atol=1e-4, rtol=1e-4), \
        float(jnp.max(jnp.abs(out2 - ref2)))

    print("KERNEL_OK")
</pallas_src>

<mosaic_0001>
module attributes {stable_mosaic.version = 11 : i64} {
  func.func @_block_kernel(%arg0: i32, %arg1: i32, %arg2: memref<8x128xf32, #tpu.memory_space<vmem>>, %arg3: memref<1x128xf32, #tpu.memory_space<vmem>>, %arg4: memref<1x128xf32, #tpu.memory_space<vmem>>, %arg5: memref<128x512xbf16, #tpu.memory_space<vmem>>, %arg6: memref<1x512xf32, #tpu.memory_space<vmem>>, %arg7: memref<512x128xbf16, #tpu.memory_space<vmem>>, %arg8: memref<1x128xf32, #tpu.memory_space<vmem>>, %arg9: memref<8x128xf32, #tpu.memory_space<vmem>>, %arg10: memref<8x128xbf16, #tpu.memory_space<vmem>>, %arg11: memref<8x128xf32, #tpu.memory_space<vmem>>) attributes {dimension_semantics = [#tpu.dimension_semantics<parallel>, #tpu.dimension_semantics<arbitrary>], iteration_bounds = array<i64: 2, 1>, scalar_prefetch = 0 : i64, scratch_operands = 2 : i64, tpu.core_type = #tpu.core_type<tc>, window_params = [{transform_indices = @transform_0, window_bounds = array<i64: 8, 128>}, {pipeline_mode = #tpu.pipeline_mode<synchronous>, transform_indices = @transform_1, window_bounds = array<i64: 1, 128>}, {pipeline_mode = #tpu.pipeline_mode<synchronous>, transform_indices = @transform_2, window_bounds = array<i64: 1, 128>}, {transform_indices = @transform_3, window_bounds = array<i64: 128, 512>}, {transform_indices = @transform_4, window_bounds = array<i64: 1, 512>}, {transform_indices = @transform_5, window_bounds = array<i64: 512, 128>}, {pipeline_mode = #tpu.pipeline_mode<synchronous>, transform_indices = @transform_6, window_bounds = array<i64: 1, 128>}, {transform_indices = @transform_7, window_bounds = array<i64: 8, 128>}]} {
    %c0_i32 = arith.constant 0 : i32
    %0 = arith.cmpi eq, %arg1, %c0_i32 : i32
    %1 = arith.extui %0 : i1 to i32
    %c0_i32_0 = arith.constant 0 : i32
    %2 = arith.cmpi ne, %1, %c0_i32_0 : i32
    scf.if %2 {
      %c0_19 = arith.constant 0 : index
      %c0_20 = arith.constant 0 : index
      %34 = vector.load %arg2[%c0_19, %c0_20] : memref<8x128xf32, #tpu.memory_space<vmem>>, vector<8x128xf32>
      %cst_21 = arith.constant dense<0.000000e+00> : vector<8xf32>
      %35 = vector.multi_reduction <add>, %34, %cst_21 [1] : vector<8x128xf32> to vector<8xf32>
      %36 = vector.shape_cast %35 : vector<8xf32> to vector<8x1xf32>
      %cst_22 = arith.constant 1.280000e+02 : f32
      %37 = vector.broadcast %cst_22 : f32 to vector<8x1xf32>
      %38 = arith.divf %36, %37 : vector<8x1xf32>
      %39 = vector.broadcast %38 : vector<8x1xf32> to vector<8x128xf32>
      %40 = arith.subf %34, %39 : vector<8x128xf32>
      %41 = arith.mulf %40, %40 : vector<8x128xf32>
      %cst_23 = arith.constant dense<0.000000e+00> : vector<8xf32>
      %42 = vector.multi_reduction <add>, %41, %cst_23 [1] : vector<8x128xf32> to vector<8xf32>
      %43 = vector.shape_cast %42 : vector<8xf32> to vector<8x1xf32>
      %cst_24 = arith.constant 1.280000e+02 : f32
      %44 = vector.broadcast %cst_24 : f32 to vector<8x1xf32>
      %45 = arith.divf %43, %44 : vector<8x1xf32>
      %cst_25 = arith.constant 9.99999974E-6 : f32
      %46 = vector.broadcast %cst_25 : f32 to vector<8x1xf32>
      %47 = arith.addf %45, %46 : vector<8x1xf32>
      %48 = math.rsqrt %47 : vector<8x1xf32>
      %49 = vector.broadcast %48 : vector<8x1xf32> to vector<8x128xf32>
      %50 = arith.mulf %40, %49 : vector<8x128xf32>
      %c0_26 = arith.constant 0 : index
      %c0_27 = arith.constant 0 : index
      %51 = vector.load %arg3[%c0_26, %c0_27] : memref<1x128xf32, #tpu.memory_space<vmem>>, vector<1x128xf32>
      %52 = vector.broadcast %51 : vector<1x128xf32> to vector<8x128xf32>
      %53 = arith.mulf %50, %52 : vector<8x128xf32>
      %c0_28 = arith.constant 0 : index
      %c0_29 = arith.constant 0 : index
      %54 = vector.load %arg4[%c0_28, %c0_29] : memref<1x128xf32, #tpu.memory_space<vmem>>, vector<1x128xf32>
      %55 = vector.broadcast %54 : vector<1x128xf32> to vector<8x128xf32>
      %56 = arith.addf %53, %55 : vector<8x128xf32>
      %57 = arith.truncf %56 : vector<8x128xf32> to vector<8x128xbf16>
      %c0_30 = arith.constant 0 : index
      %c0_31 = arith.constant 0 : index
      %58 = vector.load %arg10[%c0_30, %c0_31] : memref<8x128xbf16, #tpu.memory_space<vmem>>, vector<8x128xbf16>
      tpu.vector_store %arg10[%c0_30, %c0_31], %57 {strides = array<i32>} : memref<8x128xbf16, #tpu.memory_space<vmem>>, vector<8x128xbf16>,
    } else {
    }
    %c0 = arith.constant 0 : index
    %c0_1 = arith.constant 0 : index
    %3 = vector.load %arg10[%c0, %c0_1] : memref<8x128xbf16, #tpu.memory_space<vmem>>, vector<8x128xbf16>
    %c0_2 = arith.constant 0 : index
    %c0_3 = arith.constant 0 : index
    %4 = vector.load %arg5[%c0_2, %c0_3] : memref<128x512xbf16, #tpu.memory_space<vmem>>, vector<128x512xbf16>
    %cst = arith.constant dense<0.000000e+00> : vector<8x512xf32>
    %5 = tpu.matmul %3, %4, %cst {dimension_numbers = #tpu.dot_dimension_numbers<[1], [0], [0], [1], [0, 0, 1, 1], [], []>} : vector<8x128xbf16>, vector<128x512xbf16>, vector<8x512xf32> -> vector<8x512xf32>
    %c0_4 = arith.constant 0 : index
    %c0_5 = arith.constant 0 : index
    %6 = vector.load %arg6[%c0_4, %c0_5] : memref<1x512xf32, #tpu.memory_space<vmem>>, vector<1x512xf32>
    %7 = vector.broadcast %6 : vector<1x512xf32> to vector<8x512xf32>
    %8 = arith.addf %5, %7 : vector<8x512xf32>
    %cst_6 = arith.constant 5.000000e-01 : f32
    %9 = vector.broadcast %cst_6 : f32 to vector<8x512xf32>
    %10 = arith.mulf %9, %8 : vector<8x512xf32>
    %cst_7 = arith.constant 4.471500e-02 : f32
    %11 = vector.broadcast %cst_7 : f32 to vector<8x512xf32>
    %12 = arith.mulf %11, %8 : vector<8x512xf32>
    %13 = arith.mulf %12, %8 : vector<8x512xf32>
    %14 = arith.mulf %13, %8 : vector<8x512xf32>
    %15 = arith.addf %8, %14 : vector<8x512xf32>
    %cst_8 = arith.constant 0.797884583 : f32
    %16 = vector.broadcast %cst_8 : f32 to vector<8x512xf32>
    %17 = arith.mulf %16, %15 : vector<8x512xf32>
    %18 = math.tanh %17 : vector<8x512xf32>
    %cst_9 = arith.constant 1.000000e+00 : f32
    %19 = vector.broadcast %cst_9 : f32 to vector<8x512xf32>
    %20 = arith.addf %19, %18 : vector<8x512xf32>
    %21 = arith.mulf %10, %20 : vector<8x512xf32>
    %22 = arith.truncf %21 : vector<8x512xf32> to vector<8x512xbf16>
    %c0_10 = arith.constant 0 : index
    %c0_11 = arith.constant 0 : index
    %23 = vector.load %arg7[%c0_10, %c0_11] : memref<512x128xbf16, #tpu.memory_space<vmem>>, vector<512x128xbf16>
    %cst_12 = arith.constant dense<0.000000e+00> : vector<8x128xf32>
    %24 = tpu.matmul %22, %23, %cst_12 {dimension_numbers = #tpu.dot_dimension_numbers<[1], [0], [0], [1], [0, 0, 1, 1], [], []>} : vector<8x512xbf16>, vector<512x128xbf16>, vector<8x128xf32> -> vector<8x128xf32>
    %c0_i32_13 = arith.constant 0 : i32
    %25 = arith.cmpi eq, %arg1, %c0_i32_13 : i32
    %26 = arith.extui %25 : i1 to i32
    %c0_i32_14 = arith.constant 0 : i32
    %27 = arith.cmpi ne, %26, %c0_i32_14 : i32
    scf.if %27 {
      %c0_19 = arith.constant 0 : index
      %c0_20 = arith.constant 0 : index
      %34 = vector.load %arg11[%c0_19, %c0_20] : memref<8x128xf32, #tpu.memory_space<vmem>>, vector<8x128xf32>
      tpu.vector_store %arg11[%c0_19, %c0_20], %24 {strides = array<i32>} : memref<8x128xf32, #tpu.memory_space<vmem>>, vector<8x128xf32>,
    } else {
    }
    %c0_i32_15 = arith.constant 0 : i32
    %28 = arith.cmpi sgt, %arg1, %c0_i32_15 : i32
    %29 = arith.extui %28 : i1 to i32
    %c0_i32_16 = arith.constant 0 : i32
    %30 = arith.cmpi ne, %29, %c0_i32_16 : i32
    scf.if %30 {
      %c0_19 = arith.constant 0 : index
      %c0_20 = arith.constant 0 : index
      %34 = vector.load %arg11[%c0_19, %c0_20] : memref<8x128xf32, #tpu.memory_space<vmem>>, vector<8x128xf32>
      %35 = arith.addf %34, %24 : vector<8x128xf32>
      %c0_21 = arith.constant 0 : index
      %c0_22 = arith.constant 0 : index
      %36 = vector.load %arg11[%c0_21, %c0_22] : memref<8x128xf32, #tpu.memory_space<vmem>>, vector<8x128xf32>
      tpu.vector_store %arg11[%c0_21, %c0_22], %35 {strides = array<i32>} : memref<8x128xf32, #tpu.memory_space<vmem>>, vector<8x128xf32>,
    } else {
    }
    %c0_i32_17 = arith.constant 0 : i32
    %31 = arith.cmpi eq, %arg1, %c0_i32_17 : i32
    %32 = arith.extui %31 : i1 to i32
    %c0_i32_18 = arith.constant 0 : i32
    %33 = arith.cmpi ne, %32, %c0_i32_18 : i32
    scf.if %33 {
      %c0_19 = arith.constant 0 : index
      %c0_20 = arith.constant 0 : index
      %34 = vector.load %arg11[%c0_19, %c0_20] : memref<8x128xf32, #tpu.memory_space<vmem>>, vector<8x128xf32>
      %c0_21 = arith.constant 0 : index
      %c0_22 = arith.constant 0 : index
      %35 = vector.load %arg8[%c0_21, %c0_22] : memref<1x128xf32, #tpu.memory_space<vmem>>, vector<1x128xf32>
      %36 = vector.broadcast %35 : vector<1x128xf32> to vector<8x128xf32>
      %37 = arith.addf %34, %36 : vector<8x128xf32>
      %c0_23 = arith.constant 0 : index
      %c0_24 = arith.constant 0 : index
      %38 = vector.load %arg2[%c0_23, %c0_24] : memref<8x128xf32, #tpu.memory_space<vmem>>, vector<8x128xf32>
      %39 = arith.addf %37, %38 : vector<8x128xf32>
      %c0_25 = arith.constant 0 : index
      %c0_26 = arith.constant 0 : index
      %40 = vector.load %arg9[%c0_25, %c0_26] : memref<8x128xf32, #tpu.memory_space<vmem>>, vector<8x128xf32>
      tpu.vector_store %arg9[%c0_25, %c0_26], %39 {strides = array<i32>} : memref<8x128xf32, #tpu.memory_space<vmem>>, vector<8x128xf32>,
    } else {
    }
    return
  }
  func.func @transform_0(%arg0: i32, %arg1: i32) -> (i32, i32) {
    %c0_i32 = arith.constant 0 : i32
    %c0_i32_0 = arith.constant 0 : i32
    return %arg0, %c0_i32 : i32, i32
  }
  func.func @transform_1(%arg0: i32, %arg1: i32) -> (i32, i32) {
    %c0_i32 = arith.constant 0 : i32
    %c0_i32_0 = arith.constant 0 : i32
    %c0_i32_1 = arith.constant 0 : i32
    return %c0_i32, %c0_i32_0 : i32, i32
  }
  func.func @transform_2(%arg0: i32, %arg1: i32) -> (i32, i32) {
    %c0_i32 = arith.constant 0 : i32
    %c0_i32_0 = arith.constant 0 : i32
    %c0_i32_1 = arith.constant 0 : i32
    return %c0_i32, %c0_i32_0 : i32, i32
  }
  func.func @transform_3(%arg0: i32, %arg1: i32) -> (i32, i32) {
    %c0_i32 = arith.constant 0 : i32
    %c0_i32_0 = arith.constant 0 : i32
    return %c0_i32, %arg1 : i32, i32
  }
  func.func @transform_4(%arg0: i32, %arg1: i32) -> (i32, i32) {
    %c0_i32 = arith.constant 0 : i32
    %c0_i32_0 = arith.constant 0 : i32
    return %c0_i32, %arg1 : i32, i32
  }
  func.func @transform_5(%arg0: i32, %arg1: i32) -> (i32, i32) {
    %c0_i32 = arith.constant 0 : i32
    %c0_i32_0 = arith.constant 0 : i32
    return %arg1, %c0_i32 : i32, i32
  }
  func.func @transform_6(%arg0: i32, %arg1: i32) -> (i32, i32) {
    %c0_i32 = arith.constant 0 : i32
    %c0_i32_0 = arith.constant 0 : i32
    %c0_i32_1 = arith.constant 0 : i32
    return %c0_i32, %c0_i32_0 : i32, i32
  }
  func.func @transform_7(%arg0: i32, %arg1: i32) -> (i32, i32) {
    %c0_i32 = arith.constant 0 : i32
    %c0_i32_0 = arith.constant 0 : i32
    return %arg0, %c0_i32 : i32, i32
  }
}

</mosaic_0001>

<bundles_post_ra>
// kernel: tpu_custom_call.1
= control target key start
LH: loop header
LB: loop body
LE: loop exit
PB: predicated region body
PF: predicated region fallthrough
CT: control target
= control target key end

     0   :  { %12 = vsyncpa [#allocation5], 0  ;;  %s2040_s0 = inlined_call_operand.hbm [shape: f32[16,128], index: 0, kind: input, shape index: {}]   ;;  %s2041_s1 = inlined_call_operand.vmem [shape: f32[1,128], index: 1, kind: input, shape index: {}]   ;;  %s2042_s2 = inlined_call_operand.vmem [shape: f32[1,128], index: 2, kind: input, shape index: {}]   ;;  %s2043_s3 = inlined_call_operand.hbm [shape: bf16[128,512], index: 3, kind: input, shape index: {}]   ;;  %s2044_s4 = inlined_call_operand.vmem [shape: f32[1,512], index: 4, kind: input, shape index: {}]   ;;  %s2045_s5 = inlined_call_operand.hbm [shape: bf16[512,128], index: 5, kind: input, shape index: {}]   ;;  %s2046_s6 = inlined_call_operand.vmem [shape: f32[1,128], index: 6, kind: input, shape index: {}]   ;;  %s2047_s7 = inlined_call_operand.hbm [shape: f32[16,128], index: 7, kind: output, shape index: {}]  }
   0x1   :  { %14 = vsyncpa [#allocation5 + $0x1], 0 }
   0x2   :  { %15 = vsyncpa [#allocation8], 0 }
   0x3   :  { %16 = vsyncpa [#allocation6], 0 }
   0x4   :  { %18 = vsyncpa [#allocation6 + $0x1], 0  ;;  %s1764_s24 = smov 0   ;;  %s1766_s25 = smov 0  }
   0x5   :  { %s1768_s26 = smov 0   ;;  %s1770_s27 = smov 0  }
   0x6   :  { %s1772_s28 = smov 0   ;;  %s1774_s29 = smov 0  }
   0x7 LB: > { %2054 = sst [smem:[#allocation14_spill]] %s1693_s24  ;;  %s1234_s30 = sadd.s32 4294967295, %s1713_s29   ;;  %s1713_s29 = sphi %s1774_s29, %s24_s29   ;;  %s1709_s28 = sphi %s1772_s28, %s2075_s28   ;;  %s1705_s27 = sphi %s1770_s27, %s2074_s27   ;;  %s1701_s26 = sphi %s1768_s26, %s2073_s26   ;;  %s1697_s25 = sphi %s1766_s25, %s2072_s25   ;;  %s1693_s24 = sphi %s1764_s24, %s2071_s24  }
   0x8   : > { %s1235_s8 = sadd.s32 4294967294, %s1713_s29   ;;  %p56_p0 = scmp.ne.s32.totalorder %s1697_s25, %s1693_s24 }
   0x9   : > { %p1798_p1 = scmp.eq.s32.totalorder %s1234_s30, 0  ;;  %p1802_p2 = scmp.eq.s32.totalorder %s1234_s30, 1 }
   0xa   : > { %p227_p3 = scmp.eq.s32.totalorder %s1235_s8, 1  ;;  %p1236_p5 = scmp.ge.s32.totalorder %s1713_s29, 1 }
   0xb   : > { %s2055_s9 = scalar_select %p1798_p1, 1, 0 }
   0xc   : > { %p1808_p4 = por %p1798_p1, %p56_p0  ;;  %p1813_p6 = por %p227_p3, %p56_p0 }
   0xd   : > { %p234_p7 = scmp.lt.s32.totalorder %s1713_s29, 3  ;;  %s1715_s14 = smov [#allocation7]  }
   0xe   : > { %s2057_s11 = scalar_select %p1808_p4, 1, 0 }
   0xf   : > { %s2058_s12 = scalar_select %p1813_p6, 1, 0 }
  0x10   : > { %p1818_p8 = pnand %p1236_p5, %p234_p7  ;;  %s255_s15 = sshll.u32 %s1715_s14, 4  ;;  %s1822_s15 = int_to_ptr.vmem [resolvable:$true] %s255_s15 }
  0x11   : > { %2059 = sst [smem:[#allocation15_spill]] %s2058_s12  ;;  %s1716_s17 = smov [#allocation9]  }
  0x12   : > { %p1375_p9 = pneg %p1818_p8  ;;  %s279_s18 = sshll.u32 %s1716_s17, 4  ;;  %s1833_s18 = int_to_ptr.vmem [resolvable:$true] %s279_s18 }
  0x13   : > { %s1541_s21 = scalar_lea.hbm %s2043_s3, 4096 }
  0x14   : > { %p1829_p11 = pnand %p1375_p9, %p1798_p1  ;;  %p1542_p12 = scmp.ne.s32.totalorder %s2043_s3, %s1541_s21 }
  0x15   : > { %p1548_p5 = scmp.lt.u32.totalorder %s1541_s21, %s2043_s3 }
  0x16   : > { %p1543_p13 = pneg %p1829_p11 }
  0x18   : > { %p1544_p0 = pnand %p1543_p13, %p1542_p12 }
  0x1a   : > { %p1545_p3 = pneg %p1544_p0 }
  0x1c   : > { %p1550_p7 = pnand %p1548_p5, %p1545_p3 }
  0x1e   : > { %1553 = shalt.err (!%p1550_p7)
}
  0x1f   : > { %s1554_s14 = scalar_lea.vmem %s1822_s15, 4096  ;;  %p1562_p1 = scmp.lt.s32.totalorder %s1822_s15, %s1822_s15 }
  0x20   : > { %p1555_p9 = scmp.ne.s32.totalorder %s1822_s15, %s1554_s14  ;;  %p1563_p12 = scmp.lt.s32.totalorder %s1554_s14, %s1554_s14 }
  0x22   : > { %p1557_p10 = pnand %p1555_p9, %p1543_p13  ;;  %p1564_p0 = por %p1563_p12, %p1562_p1 }
  0x24   : > { %p1558_p6 = pneg %p1557_p10 }
  0x26   : > { %p1565_p4 = pnand %p1564_p0, %p1558_p6 }
  0x28   : > { %1568 = shalt.err (!%p1565_p4)
}
  0x29   : > { %s1717_s17 = smov 256   ;;  %s1718_s19 = smov 16  }
  0x2a   : > { %1378 = dma.hbm_to_vmem [thread:$0]  (!%p1829_p11), %s2043_s3, 4096, %s1822_s15, [#allocation8], %s1717_s17, %s1717_s17, %s1718_s19  }
  0x2b   : > { %s1569_s30 = scalar_lea.hbm %s2045_s5, 4096 }
  0x2c   : > { %p1570_p1 = scmp.ne.s32.totalorder %s2045_s5, %s1569_s30  ;;  %p1576_p10 = scmp.lt.u32.totalorder %s1569_s30, %s2045_s5 }
  0x2e   : > { %p1572_p4 = pnand %p1570_p1, %p1543_p13 }
  0x30   : > { %p1573_p6 = pneg %p1572_p4 }
  0x32   : > { %p1578_p3 = pnand %p1576_p10, %p1573_p6 }
  0x34   : > { %1581 = shalt.err (!%p1578_p3)
}
  0x35   : > { %s1582_s15 = scalar_lea.vmem %s1833_s18, 4096  ;;  %p1590_p12 = scmp.lt.s32.totalorder %s1833_s18, %s1833_s18 }
  0x36   : > { %p1583_p5 = scmp.ne.s32.totalorder %s1833_s18, %s1582_s15  ;;  %p1591_p0 = scmp.lt.s32.totalorder %s1582_s15, %s1582_s15 }
  0x38   : > { %p1585_p7 = pnand %p1583_p5, %p1543_p13  ;;  %p1592_p1 = por %p1591_p0, %p1590_p12 }
  0x3a   : > { %p1586_p9 = pneg %p1585_p7 }
  0x3c   : > { %p1593_p4 = pnand %p1592_p1, %p1586_p9 }
  0x3e   : > { %1596 = shalt.err (!%p1593_p4)
}
  0x3f   : > { %s1719_s24 = smov 64   ;;  %s1720_s12 = smov 4  }
  0x40   : > { %1381 = dma.hbm_to_vmem [thread:$0]  (!%p1829_p11), %s2045_s5, 4096, %s1833_s18, [#allocation8], %s1719_s24, %s1719_s24, %s1720_s12  }
  0x41   : > { %s36_s20 = sadd.s32 1, %s1709_s28  ;;  %s43_s21 = sadd.s32 1, %s1701_s26 }
  0x42   : > { %p38_p13 = scmp.ge.s32.totalorder %s36_s20, 2  ;;  %p50_p6 = scmp.ne.s32.totalorder %s1701_s26, %s1697_s25 }
  0x43   : > { %p51_p10 = scmp.eq.s32.totalorder %s1713_s29, 0  ;;  %p1392_p3 = scmp.lt.s32.totalorder %s1713_s29, 2 }
  0x44   : > { %s2077_s20 = smov (%p38_p13, %s36_s20), 0  ;;  %p1897_p7 = por %p1802_p2, %p50_p6 }
  0x45   : > { %p52_p5 = por %p51_p10, %p50_p6  ;;  %s40_s16 = ssub.s32 %s1709_s28, %s2077_s20 }
  0x46   : > { %s2062_s22 = scalar_select %p1897_p7, 1, 0 }
  0x47   : > { %s296_s23 = sand.u32 1, %s1701_s26   ;;  %p41_p9 = scmp.eq.s32.totalorder %s40_s16, 0 }
  0x48   : > { %s1241_s18 = sshll.u32 %s296_s23, 3  ;;  %s1242_s30 = sshll.u32 %s1709_s28, 7 }
  0x49   : > { %s1906_s8 = scalar_select %p41_p9, %s1701_s26, %s43_s21  }
  0x4a   : > { %s1911_s24 = scalar_lea.hbm %s2040_s0, %s1242_s30  ;;  %s300_s10 = scalar_lea.vmem [#allocation4], %s1241_s18 }
  0x4b   : > { %s307_s12 = sshll.u32 %s300_s10, 4  ;;  %p1915_p2 = pnand %p1392_p3, %p52_p5  ;;  %s1919_s12 = int_to_ptr.vmem [resolvable:$true] %s307_s12 }
  0x4c   : > { %s297_s19 = scalar_lea.sflag [#allocation5], %s296_s23  ;;  %s1597_s21 = scalar_lea.hbm %s1911_s24, 128 }
  0x4d   : > { %p1598_p11 = scmp.ne.s32.totalorder %s1911_s24, %s1597_s21  ;;  %p1599_p12 = pneg %p1915_p2 }
  0x4e   : > { %s1602_s30 = scalar_lea.hbm %s2040_s0, 256  ;;  %p1603_p4 = scmp.lt.u32.totalorder %s1911_s24, %s2040_s0 }
  0x4f   : > { %p1600_p0 = pnand %p1599_p12, %p1598_p11  ;;  %p1604_p13 = scmp.lt.u32.totalorder %s1602_s30, %s1597_s21 }
  0x50   : > { %p1606_p10 = scmp.lt.u32.totalorder %s1597_s21, %s1911_s24 }
  0x51   : > { %p1601_p1 = pneg %p1600_p0  ;;  %p1605_p6 = por %p1604_p13, %p1603_p4 }
  0x53   : > { %p1607_p3 = por %p1606_p10, %p1605_p6 }
  0x55   : > { %p1608_p5 = pnand %p1607_p3, %p1601_p1 }
  0x57   : > { %1611 = shalt.err (!%p1608_p5)
}
  0x58   : > { %s1612_s23 = scalar_lea.vmem %s1919_s12, 128  ;;  %s1721_s10 = smov [#allocation4]  }
  0x59   : > { %p1613_p9 = scmp.ne.s32.totalorder %s1919_s12, %s1612_s23  ;;  %s1617_s16 = sshll.u32 %s1721_s10, 4  ;;  %s1618_s16 = int_to_ptr.vmem [resolvable:$false] %s1617_s16 }
  0x5a   : > { %s1619_s18 = scalar_lea.vmem %s1618_s16, 256  ;;  %p1620_p7 = scmp.lt.s32.totalorder %s1919_s12, %s1618_s16 }
  0x5b   : > { %p1615_p11 = pnand %p1613_p9, %p1599_p12  ;;  %p1621_p4 = scmp.lt.s32.totalorder %s1619_s18, %s1612_s23 }
  0x5d   : > { %p1616_p0 = pneg %p1615_p11  ;;  %p1622_p13 = por %p1621_p4, %p1620_p7 }
  0x5f   : > { %p1623_p6 = pnand %p1622_p13, %p1616_p0 }
  0x61   : > { %1626 = shalt.err (!%p1623_p6)
}
  0x62   : > { %1385 = dma.hbm_to_vmem [thread:$0]  (!%p1915_p2), %s1911_s24, 128, %s1919_s12, %s297_s19  }
  0x63   : > { %316 = sbr.rel (%p1818_p8) target bundleno = 911 (0x38f), region = 48  ;;  %s1949_s21 = sand.u32 (!%p1818_p8), 1, %s1697_s25  }
  0x64   : > { %s1244_s30 = sshll.u32 (!%p1818_p8), %s1949_s21, 3  ;;  %s319_s14 = scalar_lea.sflag (!%p1818_p8), [#allocation5], %s1949_s21 }
  0x65   : > { %s322_s15 = scalar_lea.vmem (!%p1818_p8), [#allocation4], %s1244_s30  ;;  %p2064_p7 = scmp.ne.s32.totalorder (!%p1818_p8), %s2057_s11, 0 }
  0x6a   : > { %1680 = dma.done.wait (%p2064_p7), %s319_s14, 128  }
  0x6b   : > { %1682 = vsyncadd (%p2064_p7), %s319_s14, 4294967168  ;;  %p2065_p2 = scmp.ne.s32.totalorder %s2055_s9, 0 }
  0x6d   : > { %1684 = dma.done.wait (%p2065_p2), [#allocation8], 8192  }
  0x6e   : > { %1686 = vsyncadd (%p2065_p2), [#allocation8], 4294959104  ;;  %v1963_v0 = vld [vmem:[%s322_s15] sm:$0xff]  ;;  %v1722_v37 = vmov 0   ;;  %v1248_v42 = vld [vmem:[%s2041_s1] ss:$0 sm:$0xff] }
  0x6f   : > { %378 = vadd.xlane.f32.xlu0 %v1963_v0  ;;  %v1451_v1 = vld [vmem:[#allocation7 + $0x4] ss:$16 sps:$4 sm:$0xff]   ;;  %v1453_v2 = vld [vmem:[#allocation7 + $0xc] ss:$16 sps:$4 sm:$0xff]   ;;  %v1455_v7 = vld [vmem:[#allocation7] ss:$16 sps:$4 sm:$0xff]   ;;  %655 = vmatprep.mubr.bf16.mxu0 %v1722_v37 }
  0x70   : > { %623 = vmatprep.subr.bf16.mxu0 %v1451_v1  ;;  %664 = vmatprep.subr.bf16.mxu1 %v1453_v2  ;;  %v1456_v8 = vld [vmem:[#allocation7 + $0x8] ss:$16 sps:$4 sm:$0xff]   ;;  %v1457_v9 = vld [vmem:[#allocation7 + $0x24] ss:$16 sps:$4 sm:$0xff]   ;;  %v1459_v10 = vld [vmem:[#allocation7 + $0x2c] ss:$16 sps:$4 sm:$0xff]  }
  0x71   : > { %624 = vmatpush1.bf16.msra.mxu0 %v1455_v7  ;;  %665 = vmatpush1.bf16.msra.mxu1 %v1456_v8  ;;  %v1461_v11 = vld [vmem:[#allocation7 + $0x20] ss:$16 sps:$4 sm:$0xff]   ;;  %v1462_v12 = vld [vmem:[#allocation7 + $0x28] ss:$16 sps:$4 sm:$0xff]   ;;  %v1463_v13 = vld [vmem:[#allocation7 + $0x44] ss:$16 sps:$4 sm:$0xff]  }
  0x72   : > { %625 = vmatprep.subr.bf16.mxu0 %v1457_v9  ;;  %666 = vmatprep.subr.bf16.mxu1 %v1459_v10  ;;  %v1465_v14 = vld [vmem:[#allocation7 + $0x4c] ss:$16 sps:$4 sm:$0xff]   ;;  %v1467_v15 = vld [vmem:[#allocation7 + $0x40] ss:$16 sps:$4 sm:$0xff]   ;;  %v1468_v16 = vld [vmem:[#allocation7 + $0x48] ss:$16 sps:$4 sm:$0xff]  }
  0x73   : > { %v1469_v17 = vld [vmem:[#allocation7 + $0x64] ss:$16 sps:$4 sm:$0xff]   ;;  %v1471_v18 = vld [vmem:[#allocation7 + $0x6c] ss:$16 sps:$4 sm:$0xff]   ;;  %v1473_v19 = vld [vmem:[#allocation7 + $0x60] ss:$16 sps:$4 sm:$0xff]   ;;  %696 = vmatprep.mubr.bf16.mxu1 %v1722_v37 }
  0x74   : > { %v1474_v20 = vld [vmem:[#allocation7 + $0x68] ss:$16 sps:$4 sm:$0xff]   ;;  %v1475_v21 = vld [vmem:[#allocation7 + $0x84] ss:$16 sps:$4 sm:$0xff]   ;;  %v1477_v22 = vld [vmem:[#allocation7 + $0x8c] ss:$16 sps:$4 sm:$0xff]  }
  0x75   : > { %626 = vmatpush1.bf16.msra.mxu0 %v1461_v11  ;;  %667 = vmatpush1.bf16.msra.mxu1 %v1462_v12  ;;  %v1479_v23 = vld [vmem:[#allocation7 + $0x80] ss:$16 sps:$4 sm:$0xff]   ;;  %v1480_v24 = vld [vmem:[#allocation7 + $0x88] ss:$16 sps:$4 sm:$0xff]   ;;  %v1481_v25 = vld [vmem:[#allocation7 + $0xa4] ss:$16 sps:$4 sm:$0xff]  }
  0x76   : > { %627 = vmatprep.subr.bf16.mxu0 %v1463_v13  ;;  %668 = vmatprep.subr.bf16.mxu1 %v1465_v14  ;;  %v1483_v26 = vld [vmem:[#allocation7 + $0xac] ss:$16 sps:$4 sm:$0xff]   ;;  %v1485_v27 = vld [vmem:[#allocation7 + $0xa0] ss:$16 sps:$4 sm:$0xff]   ;;  %v1486_v28 = vld [vmem:[#allocation7 + $0xa8] ss:$16 sps:$4 sm:$0xff]  }
  0x77   : > { %v1487_v29 = vld [vmem:[#allocation7 + $0xc4] ss:$16 sps:$4 sm:$0xff]   ;;  %v1489_v30 = vld [vmem:[#allocation7 + $0xcc] ss:$16 sps:$4 sm:$0xff]   ;;  %v1491_v31 = vld [vmem:[#allocation7 + $0xc0] ss:$16 sps:$4 sm:$0xff]  }
  0x78   : > { %v1492_v32 = vld [vmem:[#allocation7 + $0xc8] ss:$16 sps:$4 sm:$0xff]   ;;  %v1493_v33 = vld [vmem:[#allocation7 + $0xe4] ss:$16 sps:$4 sm:$0xff]   ;;  %v1495_v34 = vld [vmem:[#allocation7 + $0xec] ss:$16 sps:$4 sm:$0xff]  }
  0x79   : > { %628 = vmatpush1.bf16.msra.mxu0 %v1467_v15  ;;  %669 = vmatpush1.bf16.msra.mxu1 %v1468_v16  ;;  %v1497_v35 = vld [vmem:[#allocation7 + $0xe0] ss:$16 sps:$4 sm:$0xff]   ;;  %v1498_v36 = vld [vmem:[#allocation7 + $0xe8] ss:$16 sps:$4 sm:$0xff]   ;;  %v1249_v44 = vld [vmem:[%s2042_s2] ss:$0 sm:$0xff] }
  0x7a   : > { %629 = vmatprep.subr.bf16.mxu0 %v1469_v17  ;;  %670 = vmatprep.subr.bf16.mxu1 %v1471_v18  ;;  %v1499_v49 = vld [vmem:[#allocation9 + $0x40] sm:$0xff]   ;;  %v1503_v53 = vld [vmem:[#allocation9 + $0x48] sm:$0xff]   ;;  %v1507_v57 = vld [vmem:[#allocation9 + $0x50] sm:$0xff]   ;;  %v443_v18 = vlaneseq  ;;  %s1316_s10 = sshll.u32 %s1705_s27, 7  ;;  %s364_s16 = scalar_lea.vmem [#allocation10], %s1244_s30 }
  0x7b   : > { %v1500_v50 = vld [vmem:[#allocation9 + $0xc0] sm:$0xff]   ;;  %v1504_v54 = vld [vmem:[#allocation9 + $0xc8] sm:$0xff]   ;;  %v1508_v58 = vld [vmem:[#allocation9 + $0xd0] sm:$0xff]   ;;  %s1121_s18 = sshll.u32 %s364_s16, 4  ;;  %s1991_s9 = scalar_lea.hbm %s2047_s7, %s1316_s10  ;;  %s1993_s18 = int_to_ptr.vmem [resolvable:$true] %s1121_s18 }
  0x7c   : > { %v1501_v51 = vld [vmem:[#allocation9] sm:$0xff]   ;;  %v1505_v55 = vld [vmem:[#allocation9 + $0x8] sm:$0xff]   ;;  %v1509_v59 = vld [vmem:[#allocation9 + $0x10] sm:$0xff]   ;;  %s1108_s11 = scalar_lea.sflag [#allocation6], %s1949_s21  ;;  %s1627_s13 = scalar_lea.vmem %s1993_s18, 128 }
  0x7d   : > { %630 = vmatpush1.bf16.msra.mxu0 %v1473_v19  ;;  %671 = vmatpush1.bf16.msra.mxu1 %v1474_v20  ;;  %v1502_v52 = vld [vmem:[#allocation9 + $0x80] sm:$0xff]   ;;  %v1506_v56 = vld [vmem:[#allocation9 + $0x88] sm:$0xff]   ;;  %v1510_v60 = vld [vmem:[#allocation9 + $0x90] sm:$0xff]   ;;  %v444_v19 = vshrl.u32 %v443_v18, 7  ;;  %p1628_p8 = scmp.ne.s32.totalorder %s1993_s18, %s1627_s13  ;;  %p2066_p12 = scmp.ne.s32.totalorder %s2062_s22, 0 }
  0x7e   : > { %631 = vmatprep.subr.bf16.mxu0 %v1475_v21  ;;  %672 = vmatprep.subr.bf16.mxu1 %v1477_v22  ;;  %v1511_v61 = vld [vmem:[#allocation9 + $0x58] sm:$0xff]   ;;  %v1515_v2 = vld [vmem:[#allocation9 + $0x60] sm:$0xff]   ;;  %v1520_v7 = vld [vmem:[#allocation9 + $0xe8] sm:$0xff]   ;;  %s1723_s27 = smov [#allocation10]  }
  0x7f   : > { %v1512_v62 = vld [vmem:[#allocation9 + $0xd8] sm:$0xff]   ;;  %v1521_v8 = vld [vmem:[#allocation9 + $0x28] sm:$0xff]   ;;  %v1523_v10 = vld [vmem:[#allocation9 + $0x70] sm:$0xff]   ;;  %v445_v20 = vsub.s32 0, %v444_v19  ;;  %v453_v21 = vsub.s32 2, %v444_v19  ;;  %p1629_p1 = pnand %p1628_p8, %p2066_p12  ;;  %s1631_s30 = sshll.u32 %s1723_s27, 4  ;;  %s1632_s30 = int_to_ptr.vmem [resolvable:$false] %s1631_s30 }
  0x80   : > { %v1513_v63 = vld [vmem:[#allocation9 + $0x18] sm:$0xff]   ;;  %v1522_v9 = vld [vmem:[#allocation9 + $0xa8] sm:$0xff]   ;;  %v1524_v11 = vld [vmem:[#allocation9 + $0xf0] sm:$0xff]   ;;  %s1633_s24 = scalar_lea.vmem %s1632_s30, 256  ;;  %p1634_p3 = scmp.lt.s32.totalorder %s1993_s18, %s1632_s30 }
  0x81   : > { %632 = vmatpush1.bf16.msra.mxu0 %v1479_v23  ;;  %673 = vmatpush1.bf16.msra.mxu1 %v1480_v24  ;;  %v1514_v1 = vld [vmem:[#allocation9 + $0x98] sm:$0xff]   ;;  %v1525_v12 = vld [vmem:[#allocation9 + $0x30] sm:$0xff]   ;;  %v441_v22 = vld [vmem:[%s2044_s4] sm:$0xf]  ;;  %v449_v23 = vsub.s32 1, %v444_v19  ;;  %v457_v24 = vsub.s32 3, %v444_v19  ;;  %p1630_p10 = pneg %p1629_p1  ;;  %p1635_p5 = scmp.lt.s32.totalorder %s1633_s24, %s1627_s13 }
  0x82   : > { %633 = vmatprep.subr.bf16.mxu0 %v1481_v25  ;;  %674 = vmatprep.subr.bf16.mxu1 %v1483_v26  ;;  %v1526_v13 = vld [vmem:[#allocation9 + $0xb0] sm:$0xff]   ;;  %v1527_v14 = vld [vmem:[#allocation9 + $0x78] sm:$0xff]   ;;  %v446_v25 = vrot.slane %v441_v22, %v445_v20  ;;  %v454_v26 = vrot.slane %v441_v22, %v453_v21 }
  0x83   : > { %v1528_v15 = vld [vmem:[#allocation9 + $0xf8] sm:$0xff]   ;;  %p1636_p9 = por %p1635_p5, %p1634_p3 }
  0x84   : > { %v1529_v16 = vld [vmem:[#allocation9 + $0x38] sm:$0xff]  }
  0x85   : > { %634 = vmatpush1.bf16.msra.mxu0 %v1485_v27  ;;  %675 = vmatpush1.bf16.msra.mxu1 %v1486_v28  ;;  %v1530_v17 = vld [vmem:[#allocation9 + $0xb8] sm:$0xff]   ;;  %v450_v27 = vrot.slane %v441_v22, %v449_v23  ;;  %v458_v28 = vrot.slane %v441_v22, %v457_v24  ;;  %p1637_p11 = pnand %p1636_p9, %p1630_p10 }
  0x86   : > { %635 = vmatprep.subr.bf16.mxu0 %v1487_v29  ;;  %676 = vmatprep.subr.bf16.mxu1 %v1489_v30 }
  0x89   : > { %636 = vmatpush1.bf16.msra.mxu0 %v1491_v31  ;;  %677 = vmatpush1.bf16.msra.mxu1 %v1492_v32 }
  0x8a   : > { %637 = vmatprep.subr.bf16.mxu0 %v1493_v33  ;;  %678 = vmatprep.subr.bf16.mxu1 %v1495_v34 }
  0x8d   : > { %638 = vmatpush1.bf16.msra.mxu0 %v1497_v35  ;;  %679 = vmatpush1.bf16.msra.mxu1 %v1498_v36 }
  0x8e   : > { %1319 = vmatprep.subr.bf16.mxu0 %v1499_v49  ;;  %1341 = vmatprep.subr.bf16.mxu1 %v1500_v50 }
  0xfc   : > { %v379_v3 = vpop.xlane.xlu0 %378 }
  0xfd   : > { %v381_v4 = vmul.f32 0.0078125, %v379_v3  ;;  %v1516_v3 = vld [vmem:[#allocation9 + $0xe0] sm:$0xff]  }
  0xff   : > { %v1967_v5 = vsub.f32 %v1963_v0, %v381_v4  ;;  %v1517_v4 = vld [vmem:[#allocation9 + $0x20] sm:$0xff]  }
 0x101   : > { %v383_v6 = vmul.f32 %v1967_v5, %v1967_v5 }
 0x103   : > { %384 = vadd.xlane.f32.xlu0 %v383_v6  ;;  %v1519_v6 = vld [vmem:[#allocation9 + $0x68] sm:$0xff]  }
 0x190   : > { %v385_v38 = vpop.xlane.xlu0 %384 }
 0x191   : > { %v386_v39 = vmul.f32 0.0078125, %v385_v38 }
 0x193   : > { %v387_v40 = vadd.f32 1e-05, %v386_v39 }
 0x195   : > { %1531 = vrsqrt.f32 %v387_v40 }
 0x19f   : > { %v1532_v41 = vpop.eup %1531 }
 0x1a0   : > { %v389_v43 = vmul.f32 %v1532_v41, %v1967_v5  ;;  %v1518_v5 = vld [vmem:[#allocation9 + $0xa0] sm:$0xff]  }
 0x1a2   : > { %v397_v45 = vmul.f32 %v1248_v42, %v389_v43 }
 0x1a4   : > { %v405_v46 = vadd.f32 %v1249_v44, %v397_v45 }
 0x1a6   : > { %v406_v47 = vpack.c.bf16 %v405_v46, %v405_v46 }
 0x1a8   : > { %407 = vst [vmem:[#allocation2] sm:$0xf] %v406_v47 }
 0x1af   : > { %v408_v48 = vld [vmem:[#allocation2] sm:$0xf] }
 0x1b0   : > { %656 = vmatmul.mubr.bf16.vlgmr.msra.gmra.mrb[0].mxu0 %v408_v48  ;;  %697 = vmatmul.mubr.bf16.vlgmr.msra.gmra.mrb[0].mxu1 %v408_v48 }
 0x1b1   : > { %1320 = vmatpush3.bf16.msra.mxu0 %v1501_v51  ;;  %1342 = vmatpush3.bf16.msra.mxu1 %v1502_v52 }
 0x1b2   : > { %1321 = vmatprep.subr.bf16.mxu0 %v1503_v53  ;;  %1343 = vmatprep.subr.bf16.mxu1 %v1504_v54 }
 0x1b5   : > { %1322 = vmatpush3.bf16.msra.mxu0 %v1505_v55  ;;  %1344 = vmatpush3.bf16.msra.mxu1 %v1506_v56 }
 0x1b6   : > { %1323 = vmatprep.subr.bf16.mxu0 %v1507_v57  ;;  %1345 = vmatprep.subr.bf16.mxu1 %v1508_v58 }
 0x1b9   : > { %1324 = vmatpush3.bf16.msra.mxu0 %v1509_v59  ;;  %1346 = vmatpush3.bf16.msra.mxu1 %v1510_v60 }
 0x1ba   : > { %1325 = vmatprep.subr.bf16.mxu0 %v1511_v61  ;;  %1347 = vmatprep.subr.bf16.mxu1 %v1512_v62 }
 0x1bd   : > { %1326 = vmatpush3.bf16.msra.mxu0 %v1513_v63  ;;  %1348 = vmatpush3.bf16.msra.mxu1 %v1514_v1 }
 0x1be   : > { %1327 = vmatprep.subr.bf16.mxu0 %v1515_v2  ;;  %1349 = vmatprep.subr.bf16.mxu1 %v1516_v3 }
 0x1c1   : > { %1328 = vmatpush3.bf16.msra.mxu0 %v1517_v4  ;;  %1350 = vmatpush3.bf16.msra.mxu1 %v1518_v5 }
 0x1c2   : > { %1329 = vmatprep.subr.bf16.mxu0 %v1519_v6  ;;  %1351 = vmatprep.subr.bf16.mxu1 %v1520_v7 }
 0x1c5   : > { %1330 = vmatpush3.bf16.msra.mxu0 %v1521_v8  ;;  %1352 = vmatpush3.bf16.msra.mxu1 %v1522_v9 }
 0x1c6   : > { %1331 = vmatprep.subr.bf16.mxu0 %v1523_v10  ;;  %1353 = vmatprep.subr.bf16.mxu1 %v1524_v11 }
 0x1c9   : > { %1332 = vmatpush3.bf16.msra.mxu0 %v1525_v12  ;;  %1354 = vmatpush3.bf16.msra.mxu1 %v1526_v13 }
 0x1ca   : > { %1333 = vmatprep.subr.bf16.mxu0 %v1527_v14  ;;  %1355 = vmatprep.subr.bf16.mxu1 %v1528_v15 }
 0x1cd   : > { %1334 = vmatpush3.bf16.msra.mxu0 %v1529_v16  ;;  %1356 = vmatpush3.bf16.msra.mxu1 %v1530_v17 }
 0x283   : > { %v657_v29 = vpop.f32.mrb[0].mxu0  ;;  %v698_v30 = vpop.f32.mrb[0].mxu1 }
 0x284   : > { %v658_v31 = vadd.f32 %v657_v29, %v446_v25  ;;  %v699_v32 = vadd.f32 %v698_v30, %v454_v26  ;;  %v659_v33 = vpop.f32.mrb[1].mxu0  ;;  %v700_v34 = vpop.f32.mrb[1].mxu1 }
 0x285   : > { %v660_v35 = vadd.f32 %v659_v33, %v450_v27  ;;  %v701_v36 = vadd.f32 %v700_v34, %v458_v28  ;;  %v661_v37 = vpop.f32.mrb[2].mxu0  ;;  %v702_v38 = vpop.f32.mrb[2].mxu1  ;;  %v1314_v27 = vld [vmem:[%s2046_s6] ss:$0 sm:$0xff] }
 0x286   : > { %v709_v39 = vmul.f32 0.044715, %v658_v31  ;;  %v711_v40 = vmul.f32 0.044715, %v699_v32  ;;  %v662_v41 = vpop.f32.mrb[3].mxu0  ;;  %v703_v42 = vpop.f32.mrb[3].mxu1 }
 0x287   : > { %v710_v43 = vmul.f32 0.044715, %v660_v35  ;;  %v712_v44 = vmul.f32 0.044715, %v701_v36  ;;  %v705_v63 = vmul.f32 0.5, %v658_v31  ;;  %v706_v3 = vmul.f32 0.5, %v660_v35 }
 0x288   : > { %v713_v45 = vmul.f32 %v709_v39, %v658_v31  ;;  %v715_v46 = vmul.f32 %v711_v40, %v699_v32  ;;  %v708_v6 = vmul.f32 0.5, %v701_v36  ;;  %v707_v10 = vmul.f32 0.5, %v699_v32 }
 0x289   : > { %v714_v47 = vmul.f32 %v710_v43, %v660_v35  ;;  %v716_v48 = vmul.f32 %v712_v44, %v701_v36 }
 0x28a   : > { %v717_v49 = vmul.f32 %v713_v45, %v658_v31  ;;  %v719_v50 = vmul.f32 %v715_v46, %v699_v32 }
 0x28b   : > { %v718_v51 = vmul.f32 %v714_v47, %v660_v35  ;;  %v720_v52 = vmul.f32 %v716_v48, %v701_v36 }
 0x28c   : > { %v721_v53 = vadd.f32 %v717_v49, %v658_v31  ;;  %v723_v54 = vadd.f32 %v719_v50, %v699_v32 }
 0x28d   : > { %v722_v55 = vadd.f32 %v718_v51, %v660_v35  ;;  %v724_v56 = vadd.f32 %v720_v52, %v701_v36 }
 0x28e   : > { %v725_v57 = vmul.f32 0.7978846, %v721_v53  ;;  %v727_v60 = vmul.f32 0.7978846, %v723_v54 }
 0x28f   : > { %v726_v58 = vmul.f32 0.7978846, %v722_v55  ;;  %v728_v59 = vmul.f32 0.7978846, %v724_v56 }
 0x290   : > { %1533 = vtanh.f32 %v725_v57 }
 0x291   : > { %1535 = vtanh.f32 %v726_v58 }
 0x292   : > { %1537 = vtanh.f32 %v728_v59 }
 0x293   : > { %1539 = vtanh.f32 %v727_v60 }
 0x29a   : > { %v1534_v61 = vpop.eup %1533 }
 0x29b   : > { %v1536_v62 = vpop.eup %1535  ;;  %v733_v1 = vadd.f32 1.0, %v1534_v61 }
 0x29c   : > { %v1538_v2 = vpop.eup %1537  ;;  %v734_v4 = vadd.f32 1.0, %v1536_v62 }
 0x29d   : > { %v1540_v5 = vpop.eup %1539  ;;  %v736_v7 = vadd.f32 1.0, %v1538_v2  ;;  %v737_v8 = vmul.f32 %v733_v1, %v705_v63 }
 0x29e   : > { %v738_v9 = vmul.f32 %v734_v4, %v706_v3  ;;  %v735_v11 = vadd.f32 1.0, %v1540_v5 }
 0x29f   : > { %v740_v12 = vmul.f32 %v736_v7, %v708_v6  ;;  %v741_v16 = vpack.c.bf16 %v737_v8, %v737_v8 }
 0x2a0   : > { %v742_v13 = vpack.c.bf16 %v738_v9, %v738_v9  ;;  %v739_v14 = vmul.f32 %v735_v11, %v707_v10 }
 0x2a1   : > { %v744_v15 = vpack.c.bf16 %v740_v12, %v740_v12 }
 0x2a2   : > { %1033 = vmatprep.mubr.bf16.mxu0 %v742_v13  ;;  %v743_v17 = vpack.c.bf16 %v739_v14, %v739_v14 }
 0x2a3   : > { %1073 = vmatprep.mubr.bf16.mxu1 %v744_v15  ;;  %1034 = vmatmul.mubr.bf16.vlgmr.msra.gmra.mrb[4].mxu0 %v741_v16 }
 0x2a4   : > { %1074 = vmatmul.mubr.bf16.vlgmr.msra.gmra.mrb[4].mxu1 %v743_v17 }
 0x376   : > { %v1335_v18 = vpop.f32.mrb[4].mxu0 }
 0x377   : > { %v1357_v19 = vpop.f32.mrb[4].mxu1  ;;  %v1336_v20 = vpop.f32.mrb[5].mxu0 }
 0x378   : > { %v1337_v21 = vadd.f32 %v1336_v20, %v1335_v18  ;;  %v1358_v22 = vpop.f32.mrb[5].mxu1  ;;  %v1338_v23 = vpop.f32.mrb[6].mxu0 }
 0x379   : > { %v1359_v24 = vadd.f32 %v1358_v22, %v1357_v19  ;;  %v1360_v25 = vpop.f32.mrb[6].mxu1  ;;  %v1339_v26 = vpop.f32.mrb[7].mxu0 }
 0x37a   : > { %v1361_v28 = vpop.f32.mrb[7].mxu1 }
 0x37b   : > { %v1076_v29 = vadd.f32 %v1359_v24, %v1337_v21 }
 0x37d   : > { %v1103_v30 = vadd.f32 %v1314_v27, %v1076_v29 }
 0x37f   : > { %v1105_v31 = vadd.f32 %v1103_v30, %v1963_v0 }
 0x381   : > { %1106 = vst [vmem:[%s364_s16] sm:$0xff] %v1105_v31 }
 0x382   : > { %1640 = shalt.err (!%p1637_p11)
}
 0x383   : > { %s1641_s21 = scalar_lea.hbm %s1991_s9, 128  ;;  %s1645_s19 = scalar_lea.hbm %s2047_s7, 256 }
 0x384   : > { %p1642_p0 = scmp.ne.s32.totalorder %s1991_s9, %s1641_s21  ;;  %p1646_p6 = scmp.lt.u32.totalorder %s1991_s9, %s2047_s7 }
 0x385   : > { %p1647_p7 = scmp.lt.u32.totalorder %s1645_s19, %s1641_s21  ;;  %p1649_p8 = scmp.lt.u32.totalorder %s1641_s21, %s1991_s9 }
 0x386   : > { %p1643_p4 = pnand %p1642_p0, %p2066_p12 }
 0x387   : > { %p1648_p2 = por %p1647_p7, %p1646_p6 }
 0x388   : > { %p1644_p13 = pneg %p1643_p4 }
 0x389   : > { %p1650_p1 = por %p1649_p8, %p1648_p2 }
 0x38b   : > { %p1651_p10 = pnand %p1650_p1, %p1644_p13 }
 0x38d   : > { %1654 = shalt.err (!%p1651_p10)
}
 0x38e   : > { %1373 = dma.vmem_to_hbm [thread:$0]  (%p2066_p12), %s1993_s18, 128, %s1991_s9, %s1108_s11  }
 0x38f PF: > { %s2067_s16 = sld [smem:[#allocation14_spill]]  ;;  %s2068_s14 = sld [smem:[#allocation15_spill]] }
 0x390   : > { %p2070_p5 = scmp.ge.s32.totalorder %s1713_s29, 2 }
 0x395   : > { %s1133_s15 = sand.u32 1, %s2067_s16   ;;  %p2069_p3 = scmp.ne.s32.totalorder %s2068_s14, 0 }
 0x396   : > { %s1134_s13 = scalar_lea.sflag [#allocation6], %s1133_s15 }
 0x397   : > { %p1387_p9 = pnand %p2070_p5, %p2069_p3 }
 0x399   : > { %1688 = dma.done.wait (!%p1387_p9), %s1134_s13, 128  }
 0x39a   : > { %1690 = vsyncadd (!%p1387_p9), %s1134_s13, 4294967168  ;;  %s24_s29 = sadd.s32 1, %s1713_s29   ;;  %s2071_s24 = smov %s1697_s25 }
 0x39b   : > { %p21_p11 = scmp.ge.s32.totalorder %s24_s29, 4   ;;  %s2072_s25 = smov %s1701_s26 }
 0x39c   : > { %s2073_s26 = smov %s1906_s8  ;;  %s2074_s27 = smov %s1709_s28 }
 0x39d   : > { %s2075_s28 = smov %s2077_s20  ;;  %23 = sbr.rel (!%p21_p11) target bundleno = 7 (0x7), region = 122 }
 0x3a4   :  { %1139 = vsyncpa [#allocation5], 1 }
 0x3a5   :  { %1141 = vsyncpa [#allocation5 + $0x1], 1 }
 0x3a6   :  { %1142 = vsyncpa [#allocation8], 1 }
 0x3a7   :  { %1143 = vsyncpa [#allocation6], 1 }
 0x3a8   :  { %1145 = vsyncpa [#allocation6 + $0x1], 1 }

</bundles_post_ra>
